<compile_context>
chip_gen: v7x
topology: tpu7x:2x2x1
jax: 0.10.0
libtpu: 0.0.40
codegen_flags: <defaults>
</compile_context>

<pallas_src>
import functools

import jax
import jax.numpy as jnp
from jax import lax
from jax.experimental import pallas as pl
from jax.experimental.pallas import tpu as pltpu


_SMALL_TABLE_BYTES = 1 << 20          # tables <= 1 MiB ride resident in VMEM
_TILE_BUDGET_BYTES = 8 << 20          # budget for tile-dependent VMEM buffers


def _pick_token_tile(seq_len, hidden, n_bufs):
    """Largest power-of-two divisor of L whose n_bufs tiles fit the budget."""
    cands = [c for c in (512, 256, 128, 64, 32, 16, 8) if seq_len % c == 0]
    if not cands:
        return seq_len
    for c in cands:                              # descending
        if n_bufs * c * hidden * 4 <= _TILE_BUDGET_BYTES:
            return c
    return cands[-1]


def _vmem_limit(footprint_bytes):
    return int(min(48 << 20, max(16 << 20, footprint_bytes + (4 << 20))))


# ----------------------------------------------------------------------------
# Path 1: small table, resident in VMEM, rows read with dynamic slicing.
# ----------------------------------------------------------------------------
def _resident_table_kernel(ids_ref, pos_ref, table_ref, out_ref, *, tl):
    """grid = (n_l, B); batch innermost so pos/table tiles stay resident."""
    l = pl.program_id(0)
    b = pl.program_id(1)
    base = l * tl

    def body(t, carry):
        tok = ids_ref[b, base + t]                       # SMEM scalar read
        row = table_ref[pl.ds(tok, 1), :]                # (1, D) dynamic row
        out_ref[0, pl.ds(t, 1), :] = row + pos_ref[pl.ds(t, 1), :]
        return carry

    lax.fori_loop(0, tl, body, 0, unroll=min(tl, 8))


# ----------------------------------------------------------------------------
# Path 2: large table in HBM, double-buffered per-row DMA gather.
# ----------------------------------------------------------------------------
def _dma_gather_kernel(ids_ref, pos_ref, table_hbm, out_ref, row_buf, sems, *, tl):
    """grid = (n_l, B); inner axis 'arbitrary' so step b+1 runs next on-core."""
    l = pl.program_id(0)
    b = pl.program_id(1)
    nb = pl.num_programs(1)
    base = l * tl
    slot = b % 2

    def issue_tile(bb, sl):
        # Issue tl row copies for batch bb into buffer slot sl, all signaling
        # the single per-slot DMA semaphore.
        def body(t, carry):
            tok = ids_ref[bb, base + t]
            pltpu.make_async_copy(
                table_hbm.at[pl.ds(tok, 1), :],          # (1, D) row in HBM
                row_buf.at[sl, pl.ds(t, 1), :],          # (1, D) slot in VMEM
                sems.at[sl],
            ).start()
            return carry

        lax.fori_loop(0, tl, body, 0, unroll=min(tl, 8))

    # First inner step of this l-tile: fetch its own rows (nothing prefetched).
    @pl.when(b == 0)
    def _():
        issue_tile(b, slot)

    # Prefetch the NEXT batch's rows into the other slot before waiting, so the
    # gather for step b+1 overlaps this step's wait + compute + writeback.
    @pl.when(b + 1 < nb)
    def _():
        issue_tile(b + 1, 1 - slot)

    # Wait for the tl copies of the current slot (same-shaped wait descriptors
    # against the shared per-slot semaphore).
    def wait_body(t, carry):
        pltpu.make_async_copy(
            table_hbm.at[pl.ds(0, 1), :],
            row_buf.at[slot, pl.ds(0, 1), :],
            sems.at[slot],
        ).wait()
        return carry

    lax.fori_loop(0, tl, wait_body, 0, unroll=min(tl, 8))

    # One vectorized, lane-dense add + store per tile.
    out_ref[0] = row_buf[slot] + pos_ref[...]


# ----------------------------------------------------------------------------
# Wrapper
# ----------------------------------------------------------------------------
@jax.jit
def token_position_embeddings(tokens, table, pos_enc):
    """tokens (B, L) int32, table (V, D) f32, pos_enc (L, D) f32 -> (B, L, D)."""
    B, L = tokens.shape
    V, D = table.shape
    pos_enc = pos_enc[:L]

    # Safe gather: clamp ids (PyTorch would raise; a bad DMA would fault the chip).
    ids = jnp.clip(tokens.astype(jnp.int32), 0, V - 1)

    small = (V * D * 4) <= _SMALL_TABLE_BYTES

    if small:
        tl = _pick_token_tile(L, D, n_bufs=4)
        n_l = L // tl if L % tl == 0 else 1
        tl = L if L % tl != 0 else tl
        footprint = (4 * tl * D + 2 * V * D) * 4
        kernel = functools.partial(_resident_table_kernel, tl=tl)
        grid_spec = pltpu.PrefetchScalarGridSpec(
            num_scalar_prefetch=1,
            grid=(n_l, B),
            in_specs=[
                # pos tile: same l-tile as the output; resident across inner b.
                pl.BlockSpec((tl, D), lambda l, b, ids: (l, 0)),
                # whole table as one resident VMEM block (index map constant).
                pl.BlockSpec((V, D), lambda l, b, ids: (0, 0)),
            ],
            out_specs=pl.BlockSpec((1, tl, D), lambda l, b, ids: (b, l, 0)),
        )
        dim_sem = ("parallel", "parallel")
    else:
        tl = _pick_token_tile(L, D, n_bufs=6)
        n_l = L // tl if L % tl == 0 else 1
        tl = L if L % tl != 0 else tl
        footprint = 6 * tl * D * 4
        kernel = functools.partial(_dma_gather_kernel, tl=tl)
        grid_spec = pltpu.PrefetchScalarGridSpec(
            num_scalar_prefetch=1,
            grid=(n_l, B),
            in_specs=[
                pl.BlockSpec((tl, D), lambda l, b, ids: (l, 0)),
                # embedding table stays in HBM; rows are DMA-gathered manually.
                pl.BlockSpec(memory_space=pl.ANY),
            ],
            out_specs=pl.BlockSpec((1, tl, D), lambda l, b, ids: (b, l, 0)),
            scratch_shapes=[
                pltpu.VMEM((2, tl, D), table.dtype),     # double-buffered rows
                pltpu.SemaphoreType.DMA((2,)),           # one sem per slot
            ],
        )
        # inner axis must run sequentially on one core for the cross-step prefetch
        dim_sem = ("parallel", "arbitrary")

    return pl.pallas_call(
        kernel,
        out_shape=jax.ShapeDtypeStruct((B, L, D), table.dtype),
        grid_spec=grid_spec,
        compiler_params=pltpu.CompilerParams(
            dimension_semantics=dim_sem,
            vmem_limit_bytes=_vmem_limit(footprint),
        ),
    )(ids, pos_enc, table)


def get_position_encoding(seq_length, hidden_size, n=10000.0):
    # Matches the PyTorch double loop exactly:
    #   pe[pos, 2i]   = sin(pos / n**(2i / hidden))
    #   pe[pos, 2i+1] = cos(pos / n**((2i+1) / hidden))
    pos = jnp.arange(seq_length, dtype=jnp.float32)[:, None]            # (L, 1)
    i = jnp.arange(hidden_size // 2, dtype=jnp.float32)[None, :]        # (1, D/2)
    sin_part = jnp.sin(pos / (n ** (2.0 * i / hidden_size)))            # (L, D/2)
    cos_part = jnp.cos(pos / (n ** ((2.0 * i + 1.0) / hidden_size)))    # (L, D/2)
    pe = jnp.zeros((seq_length, hidden_size), dtype=jnp.float32)
    idx = jnp.arange(hidden_size // 2)
    pe = pe.at[:, 2 * idx].set(sin_part)
    pe = pe.at[:, 2 * idx + 1].set(cos_part)
    return pe


if __name__ == "__main__":
    key = jax.random.PRNGKey(0)
    k1, k2 = jax.random.split(key)

    def run_case(V, L, D, B, k):
        k_tok, k_tab = jax.random.split(k)
        tokens = jax.random.randint(k_tok, (B, L), 0, V, dtype=jnp.int32)
        table = jax.random.normal(k_tab, (V, D), dtype=jnp.float32)
        pos = get_position_encoding(L, D)
        out = jax.block_until_ready(token_position_embeddings(tokens, table, pos))
        ref = table[tokens] + pos[None, :, :]
        assert out.shape == (B, L, D)
        assert jnp.allclose(out, ref, atol=1e-5, rtol=1e-5), "mismatch vs reference"

    # Demo config from the module (small table -> resident-VMEM path).
    run_case(V=64, L=8, D=32, B=2, k=k1)
    # Larger table (> 1 MiB) -> HBM double-buffered DMA-gather path.
    run_case(V=2048, L=128, D=256, B=4, k=k2)

    print("KERNEL_OK")
</pallas_src>

<mosaic_0001>
module attributes {stable_mosaic.version = 11 : i64} {
  func.func @_resident_table_kernel(%arg0: i32, %arg1: i32, %arg2: memref<2x8xi32, #tpu.memory_space<smem>>, %arg3: memref<8x32xf32, #tpu.memory_space<vmem>>, %arg4: memref<64x32xf32, #tpu.memory_space<vmem>>, %arg5: memref<1x8x32xf32, #tpu.memory_space<vmem>>) attributes {dimension_semantics = [#tpu.dimension_semantics<parallel>, #tpu.dimension_semantics<parallel>], iteration_bounds = array<i64: 1, 2>, scalar_prefetch = 1 : i64, scratch_operands = 0 : i64, tpu.core_type = #tpu.core_type<tc>, window_params = [{transform_indices = @transform_0, window_bounds = array<i64: 8, 32>}, {pipeline_mode = #tpu.pipeline_mode<synchronous>, transform_indices = @transform_1, window_bounds = array<i64: 64, 32>}, {transform_indices = @transform_2, window_bounds = array<i64: 1, 8, 32>}]} {
    %c8_i32 = arith.constant 8 : i32
    %0 = arith.muli %arg0, %c8_i32 : i32
    %c0_i32 = arith.constant 0 : i32
    %1 = arith.addi %0, %c0_i32 : i32
    %2 = arith.index_cast %arg1 : i32 to index
    %3 = arith.index_cast %1 : i32 to index
    %4 = memref.load %arg2[%2, %3] : memref<2x8xi32, #tpu.memory_space<smem>>
    %5 = arith.index_cast %4 : i32 to index
    %c0 = arith.constant 0 : index
    %6 = vector.load %arg4[%5, %c0] : memref<64x32xf32, #tpu.memory_space<vmem>>, vector<1x32xf32>
    %7 = arith.index_cast %c0_i32 : i32 to index
    %c0_0 = arith.constant 0 : index
    %8 = vector.load %arg3[%7, %c0_0] : memref<8x32xf32, #tpu.memory_space<vmem>>, vector<1x32xf32>
    %9 = arith.addf %6, %8 : vector<1x32xf32>
    %c0_1 = arith.constant 0 : index
    %10 = arith.index_cast %c0_i32 : i32 to index
    %c0_2 = arith.constant 0 : index
    %11 = vector.load %arg5[%c0_1, %10, %c0_2] : memref<1x8x32xf32, #tpu.memory_space<vmem>>, vector<1x1x32xf32>
    %12 = vector.shape_cast %11 : vector<1x1x32xf32> to vector<1x32xf32>
    %13 = vector.shape_cast %9 : vector<1x32xf32> to vector<1x1x32xf32>
    tpu.vector_store %arg5[%c0_1, %10, %c0_2], %13 {strides = array<i32>} : memref<1x8x32xf32, #tpu.memory_space<vmem>>, vector<1x1x32xf32>,
    %c1_i32 = arith.constant 1 : i32
    %14 = arith.addi %0, %c1_i32 : i32
    %15 = arith.index_cast %arg1 : i32 to index
    %16 = arith.index_cast %14 : i32 to index
    %17 = memref.load %arg2[%15, %16] : memref<2x8xi32, #tpu.memory_space<smem>>
    %18 = arith.index_cast %17 : i32 to index
    %c0_3 = arith.constant 0 : index
    %19 = vector.load %arg4[%18, %c0_3] : memref<64x32xf32, #tpu.memory_space<vmem>>, vector<1x32xf32>
    %20 = arith.index_cast %c1_i32 : i32 to index
    %c0_4 = arith.constant 0 : index
    %21 = vector.load %arg3[%20, %c0_4] : memref<8x32xf32, #tpu.memory_space<vmem>>, vector<1x32xf32>
    %22 = arith.addf %19, %21 : vector<1x32xf32>
    %c0_5 = arith.constant 0 : index
    %23 = arith.index_cast %c1_i32 : i32 to index
    %c0_6 = arith.constant 0 : index
    %24 = vector.load %arg5[%c0_5, %23, %c0_6] : memref<1x8x32xf32, #tpu.memory_space<vmem>>, vector<1x1x32xf32>
    %25 = vector.shape_cast %24 : vector<1x1x32xf32> to vector<1x32xf32>
    %26 = vector.shape_cast %22 : vector<1x32xf32> to vector<1x1x32xf32>
    tpu.vector_store %arg5[%c0_5, %23, %c0_6], %26 {strides = array<i32>} : memref<1x8x32xf32, #tpu.memory_space<vmem>>, vector<1x1x32xf32>,
    %c2_i32 = arith.constant 2 : i32
    %27 = arith.addi %0, %c2_i32 : i32
    %28 = arith.index_cast %arg1 : i32 to index
    %29 = arith.index_cast %27 : i32 to index
    %30 = memref.load %arg2[%28, %29] : memref<2x8xi32, #tpu.memory_space<smem>>
    %31 = arith.index_cast %30 : i32 to index
    %c0_7 = arith.constant 0 : index
    %32 = vector.load %arg4[%31, %c0_7] : memref<64x32xf32, #tpu.memory_space<vmem>>, vector<1x32xf32>
    %33 = arith.index_cast %c2_i32 : i32 to index
    %c0_8 = arith.constant 0 : index
    %34 = vector.load %arg3[%33, %c0_8] : memref<8x32xf32, #tpu.memory_space<vmem>>, vector<1x32xf32>
    %35 = arith.addf %32, %34 : vector<1x32xf32>
    %c0_9 = arith.constant 0 : index
    %36 = arith.index_cast %c2_i32 : i32 to index
    %c0_10 = arith.constant 0 : index
    %37 = vector.load %arg5[%c0_9, %36, %c0_10] : memref<1x8x32xf32, #tpu.memory_space<vmem>>, vector<1x1x32xf32>
    %38 = vector.shape_cast %37 : vector<1x1x32xf32> to vector<1x32xf32>
    %39 = vector.shape_cast %35 : vector<1x32xf32> to vector<1x1x32xf32>
    tpu.vector_store %arg5[%c0_9, %36, %c0_10], %39 {strides = array<i32>} : memref<1x8x32xf32, #tpu.memory_space<vmem>>, vector<1x1x32xf32>,
    %c3_i32 = arith.constant 3 : i32
    %40 = arith.addi %0, %c3_i32 : i32
    %41 = arith.index_cast %arg1 : i32 to index
    %42 = arith.index_cast %40 : i32 to index
    %43 = memref.load %arg2[%41, %42] : memref<2x8xi32, #tpu.memory_space<smem>>
    %44 = arith.index_cast %43 : i32 to index
    %c0_11 = arith.constant 0 : index
    %45 = vector.load %arg4[%44, %c0_11] : memref<64x32xf32, #tpu.memory_space<vmem>>, vector<1x32xf32>
    %46 = arith.index_cast %c3_i32 : i32 to index
    %c0_12 = arith.constant 0 : index
    %47 = vector.load %arg3[%46, %c0_12] : memref<8x32xf32, #tpu.memory_space<vmem>>, vector<1x32xf32>
    %48 = arith.addf %45, %47 : vector<1x32xf32>
    %c0_13 = arith.constant 0 : index
    %49 = arith.index_cast %c3_i32 : i32 to index
    %c0_14 = arith.constant 0 : index
    %50 = vector.load %arg5[%c0_13, %49, %c0_14] : memref<1x8x32xf32, #tpu.memory_space<vmem>>, vector<1x1x32xf32>
    %51 = vector.shape_cast %50 : vector<1x1x32xf32> to vector<1x32xf32>
    %52 = vector.shape_cast %48 : vector<1x32xf32> to vector<1x1x32xf32>
    tpu.vector_store %arg5[%c0_13, %49, %c0_14], %52 {strides = array<i32>} : memref<1x8x32xf32, #tpu.memory_space<vmem>>, vector<1x1x32xf32>,
    %c4_i32 = arith.constant 4 : i32
    %53 = arith.addi %0, %c4_i32 : i32
    %54 = arith.index_cast %arg1 : i32 to index
    %55 = arith.index_cast %53 : i32 to index
    %56 = memref.load %arg2[%54, %55] : memref<2x8xi32, #tpu.memory_space<smem>>
    %57 = arith.index_cast %56 : i32 to index
    %c0_15 = arith.constant 0 : index
    %58 = vector.load %arg4[%57, %c0_15] : memref<64x32xf32, #tpu.memory_space<vmem>>, vector<1x32xf32>
    %59 = arith.index_cast %c4_i32 : i32 to index
    %c0_16 = arith.constant 0 : index
    %60 = vector.load %arg3[%59, %c0_16] : memref<8x32xf32, #tpu.memory_space<vmem>>, vector<1x32xf32>
    %61 = arith.addf %58, %60 : vector<1x32xf32>
    %c0_17 = arith.constant 0 : index
    %62 = arith.index_cast %c4_i32 : i32 to index
    %c0_18 = arith.constant 0 : index
    %63 = vector.load %arg5[%c0_17, %62, %c0_18] : memref<1x8x32xf32, #tpu.memory_space<vmem>>, vector<1x1x32xf32>
    %64 = vector.shape_cast %63 : vector<1x1x32xf32> to vector<1x32xf32>
    %65 = vector.shape_cast %61 : vector<1x32xf32> to vector<1x1x32xf32>
    tpu.vector_store %arg5[%c0_17, %62, %c0_18], %65 {strides = array<i32>} : memref<1x8x32xf32, #tpu.memory_space<vmem>>, vector<1x1x32xf32>,
    %c5_i32 = arith.constant 5 : i32
    %66 = arith.addi %0, %c5_i32 : i32
    %67 = arith.index_cast %arg1 : i32 to index
    %68 = arith.index_cast %66 : i32 to index
    %69 = memref.load %arg2[%67, %68] : memref<2x8xi32, #tpu.memory_space<smem>>
    %70 = arith.index_cast %69 : i32 to index
    %c0_19 = arith.constant 0 : index
    %71 = vector.load %arg4[%70, %c0_19] : memref<64x32xf32, #tpu.memory_space<vmem>>, vector<1x32xf32>
    %72 = arith.index_cast %c5_i32 : i32 to index
    %c0_20 = arith.constant 0 : index
    %73 = vector.load %arg3[%72, %c0_20] : memref<8x32xf32, #tpu.memory_space<vmem>>, vector<1x32xf32>
    %74 = arith.addf %71, %73 : vector<1x32xf32>
    %c0_21 = arith.constant 0 : index
    %75 = arith.index_cast %c5_i32 : i32 to index
    %c0_22 = arith.constant 0 : index
    %76 = vector.load %arg5[%c0_21, %75, %c0_22] : memref<1x8x32xf32, #tpu.memory_space<vmem>>, vector<1x1x32xf32>
    %77 = vector.shape_cast %76 : vector<1x1x32xf32> to vector<1x32xf32>
    %78 = vector.shape_cast %74 : vector<1x32xf32> to vector<1x1x32xf32>
    tpu.vector_store %arg5[%c0_21, %75, %c0_22], %78 {strides = array<i32>} : memref<1x8x32xf32, #tpu.memory_space<vmem>>, vector<1x1x32xf32>,
    %c6_i32 = arith.constant 6 : i32
    %79 = arith.addi %0, %c6_i32 : i32
    %80 = arith.index_cast %arg1 : i32 to index
    %81 = arith.index_cast %79 : i32 to index
    %82 = memref.load %arg2[%80, %81] : memref<2x8xi32, #tpu.memory_space<smem>>
    %83 = arith.index_cast %82 : i32 to index
    %c0_23 = arith.constant 0 : index
    %84 = vector.load %arg4[%83, %c0_23] : memref<64x32xf32, #tpu.memory_space<vmem>>, vector<1x32xf32>
    %85 = arith.index_cast %c6_i32 : i32 to index
    %c0_24 = arith.constant 0 : index
    %86 = vector.load %arg3[%85, %c0_24] : memref<8x32xf32, #tpu.memory_space<vmem>>, vector<1x32xf32>
    %87 = arith.addf %84, %86 : vector<1x32xf32>
    %c0_25 = arith.constant 0 : index
    %88 = arith.index_cast %c6_i32 : i32 to index
    %c0_26 = arith.constant 0 : index
    %89 = vector.load %arg5[%c0_25, %88, %c0_26] : memref<1x8x32xf32, #tpu.memory_space<vmem>>, vector<1x1x32xf32>
    %90 = vector.shape_cast %89 : vector<1x1x32xf32> to vector<1x32xf32>
    %91 = vector.shape_cast %87 : vector<1x32xf32> to vector<1x1x32xf32>
    tpu.vector_store %arg5[%c0_25, %88, %c0_26], %91 {strides = array<i32>} : memref<1x8x32xf32, #tpu.memory_space<vmem>>, vector<1x1x32xf32>,
    %c7_i32 = arith.constant 7 : i32
    %92 = arith.addi %0, %c7_i32 : i32
    %93 = arith.index_cast %arg1 : i32 to index
    %94 = arith.index_cast %92 : i32 to index
    %95 = memref.load %arg2[%93, %94] : memref<2x8xi32, #tpu.memory_space<smem>>
    %96 = arith.index_cast %95 : i32 to index
    %c0_27 = arith.constant 0 : index
    %97 = vector.load %arg4[%96, %c0_27] : memref<64x32xf32, #tpu.memory_space<vmem>>, vector<1x32xf32>
    %98 = arith.index_cast %c7_i32 : i32 to index
    %c0_28 = arith.constant 0 : index
    %99 = vector.load %arg3[%98, %c0_28] : memref<8x32xf32, #tpu.memory_space<vmem>>, vector<1x32xf32>
    %100 = arith.addf %97, %99 : vector<1x32xf32>
    %c0_29 = arith.constant 0 : index
    %101 = arith.index_cast %c7_i32 : i32 to index
    %c0_30 = arith.constant 0 : index
    %102 = vector.load %arg5[%c0_29, %101, %c0_30] : memref<1x8x32xf32, #tpu.memory_space<vmem>>, vector<1x1x32xf32>
    %103 = vector.shape_cast %102 : vector<1x1x32xf32> to vector<1x32xf32>
    %104 = vector.shape_cast %100 : vector<1x32xf32> to vector<1x1x32xf32>
    tpu.vector_store %arg5[%c0_29, %101, %c0_30], %104 {strides = array<i32>} : memref<1x8x32xf32, #tpu.memory_space<vmem>>, vector<1x1x32xf32>,
    %c8_i32_31 = arith.constant 8 : i32
    return
  }
  func.func @transform_0(%arg0: i32, %arg1: i32, %arg2: memref<2x8xi32, #tpu.memory_space<smem>>) -> (i32, i32) {
    %c0_i32 = arith.constant 0 : i32
    %c0_i32_0 = arith.constant 0 : i32
    return %arg0, %c0_i32 : i32, i32
  }
  func.func @transform_1(%arg0: i32, %arg1: i32, %arg2: memref<2x8xi32, #tpu.memory_space<smem>>) -> (i32, i32) {
    %c0_i32 = arith.constant 0 : i32
    %c0_i32_0 = arith.constant 0 : i32
    %c0_i32_1 = arith.constant 0 : i32
    return %c0_i32, %c0_i32_0 : i32, i32
  }
  func.func @transform_2(%arg0: i32, %arg1: i32, %arg2: memref<2x8xi32, #tpu.memory_space<smem>>) -> (i32, i32, i32) {
    %c0_i32 = arith.constant 0 : i32
    %c0_i32_0 = arith.constant 0 : i32
    return %arg1, %arg0, %c0_i32 : i32, i32, i32
  }
}

</mosaic_0001>

<bundles_post_ra>
// kernel: token_position_embeddings.1
= control target key start
LH: loop header
LB: loop body
LE: loop exit
PB: predicated region body
PF: predicated region fallthrough
CT: control target
= control target key end

     0   :  { %s752_s0 = inlined_call_operand.vmem [shape: s32[2,8], index: 0, kind: input, shape index: {}]   ;;  %s753_s1 = inlined_call_operand.vmem [shape: f32[8,32], index: 1, kind: input, shape index: {}]   ;;  %s754_s2 = inlined_call_operand.vmem [shape: f32[64,32], index: 2, kind: input, shape index: {}]   ;;  %s755_s3 = inlined_call_operand.hbm [shape: f32[2,8,32], index: 3, kind: output, shape index: {}]  }
   0x1   :  { %s8_s14 = sshll.u32 %s752_s0, 4  ;;  %s9_s14 = int_to_ptr.vmem [resolvable:$true] %s8_s14 }
   0x2   :  { %s441_s15 = scalar_lea.vmem %s9_s14, 32  ;;  %p446_p1 = scmp.lt.s32.totalorder %s9_s14, %s9_s14 }
   0x3   :  { %p442_p0 = scmp.ne.s32.totalorder %s9_s14, %s441_s15  ;;  %p447_p2 = scmp.lt.s32.totalorder %s441_s15, %s441_s15 }
   0x5   :  { %p448_p3 = por %p447_p2, %p446_p1 }
   0x7   :  { %p449_p4 = pnand %p448_p3, %p442_p0 }
   0x9   :  { %452 = shalt.err (!%p449_p4)  }
   0xa   :  { %s535_s16 = smov [#allocation3]  }
   0xb   :  { %11 = dma.vmem_to_smem %s9_s14, 32, %s535_s16, [#allocation2] }
   0xc   :  { %505 = dma.done.wait [#allocation2], 32 }
   0xd   :  { %506 = vsyncadd [#allocation2], 4294967264 }
   0xe   :  { %13 = sfence }
   0xf   :  { %14 = vsyncpa [#allocation5], 0 }
  0x10   :  { %16 = vsyncpa [#allocation5 + $0x1], 0  ;;  %s560_s17 = smov 0   ;;  %s562_s18 = smov 0  }
  0x11   :  { %s564_s0 = smov 0   ;;  %s566_s19 = smov 0  }
  0x12   :  { %s568_s20 = smov 0   ;;  %s570_s21 = smov 0  }
  0x13 LB: > { %759 = sst [smem:[#allocation8_spill]] %s529_s20  ;;  %s367_s22 = sadd.s32 4294967295, %s533_s21   ;;  %s533_s21 = sphi %s570_s21, %s22_s21   ;;  %s529_s20 = sphi %s568_s20, %s767_s20   ;;  %s525_s19 = sphi %s566_s19, %s766_s19   ;;  %s521_s0 = sphi %s564_s0, %s770_s0   ;;  %s517_s18 = sphi %s562_s18, %s769_s18   ;;  %s513_s17 = sphi %s560_s17, %s768_s17  }
  0x14   : > { %s368_s23 = sadd.s32 4294967294, %s533_s21   ;;  %s31_s24 = sadd.s32 1, %s529_s20 }
  0x15   : > { %s90_s25 = sadd.s32 1, %s521_s0  ;;  %p32_p5 = scmp.ge.s32.totalorder %s31_s24, 2 }
  0x16   : > { %p100_p6 = scmp.ne.s32.totalorder %s521_s0, %s517_s18  ;;  %p101_p7 = scmp.eq.s32.totalorder %s367_s22, 1 }
  0x17   : > { %p106_p8 = scmp.ne.s32.totalorder %s517_s18, %s513_s17  ;;  %s772_s24 = smov (%p32_p5, %s31_s24), 0 }
  0x18   : > { %760 = sst [smem:[#allocation9_spill]] %s772_s24  ;;  %p598_p9 = por %p101_p7, %p100_p6 }
  0x19   : > { %p107_p10 = scmp.eq.s32.totalorder %s368_s23, 1  ;;  %s85_s27 = ssub.s32 %s529_s20, %s772_s24 }
  0x1a   : > { %p371_p11 = scmp.ge.s32.totalorder %s533_s21, 1  ;;  %p88_p12 = scmp.eq.s32.totalorder %s85_s27, 0 }
  0x1b   : > { %p605_p13 = por %p107_p10, %p106_p8  ;;  %p135_p0 = scmp.lt.s32.totalorder %s533_s21, 3 }
  0x1c   : > { %s611_s29 = scalar_select %p88_p12, %s521_s0, %s90_s25  }
  0x1d   : > { %p136_p1 = pnand %p371_p11, %p135_p0 }
  0x1e   : > { %763 = sst [smem:[#allocation10_spill]] %s611_s29  ;;  %s756_s30 = sand.u32 (!%p136_p1), 1, %s517_s18   ;;  %v171_v0 = vld [vmem:[%s753_s1] sm:$0x1] (!%p136_p1)  ;;  %vm173_vm0 = vcmask (!%p136_p1), 253952  }
  0x1f   : > { %139 = sbr.rel (%p136_p1) target bundleno = 69 (0x45), region = 28  ;;  %s614_s4 = sshll.u32 (!%p136_p1), %s525_s19, 7  ;;  %v186_v3 = vld [vmem:[%s753_s1 + $0x1] sm:$0x1] (!%p136_p1)  ;;  %v200_v4 = vld [vmem:[%s753_s1 + $0x2] sm:$0x1] (!%p136_p1) }
  0x20   : > { %s372_s5 = sshll.u32 (!%p136_p1), %s756_s30, 3  ;;  %s168_s6 = sld [smem:[#allocation3 + %s614_s4]] (!%p136_p1)  ;;  %v214_v5 = vld [vmem:[%s753_s1 + $0x3] sm:$0x1] (!%p136_p1)  ;;  %v228_v6 = vld [vmem:[%s753_s1 + $0x4] sm:$0x1] (!%p136_p1) }
  0x21   : > { %s182_s7 = sadd.s32 (!%p136_p1), 1, %s614_s4  ;;  %s196_s8 = sadd.s32 (!%p136_p1), 2, %s614_s4  ;;  %v242_v13 = vld [vmem:[%s753_s1 + $0x5] sm:$0x1] (!%p136_p1)  ;;  %v256_v16 = vld [vmem:[%s753_s1 + $0x6] sm:$0x1] (!%p136_p1) }
  0x22   : > { %s183_s9 = sld [smem:[#allocation3 + %s182_s7]] (!%p136_p1)  ;;  %s210_s11 = sadd.s32 (!%p136_p1), 3, %s614_s4  ;;  %v270_v20 = vld [vmem:[%s753_s1 + $0x7] sm:$0x1] (!%p136_p1) }
  0x23   : > { %s197_s10 = sld [smem:[#allocation3 + %s196_s8]] (!%p136_p1)  ;;  %s224_s12 = sadd.s32 (!%p136_p1), 4, %s614_s4 }
  0x24   : > { %s211_s15 = sld [smem:[#allocation3 + %s210_s11]] (!%p136_p1)  ;;  %s238_s25 = sadd.s32 (!%p136_p1), 5, %s614_s4 }
  0x25   : > { %s225_s16 = sld [smem:[#allocation3 + %s224_s12]] (!%p136_p1)  ;;  %s252_s7 = sadd.s32 (!%p136_p1), 6, %s614_s4 }
  0x26   : > { %s169_s23 = scalar_lea.vmem %s754_s2, %s168_s6  ;;  %s630_s27 = sld [smem:[#allocation3 + %s238_s25]] }
  0x27   : > { %v170_v1 = vld [vmem:[%s169_s23] sm:$0x1]  ;;  %s639_s11 = sld [smem:[#allocation3 + %s252_s7]]  ;;  %s266_s12 = sadd.s32 7, %s614_s4 }
  0x28   : > { %v172_v2 = vadd.f32 %v171_v0, %v170_v1  ;;  %s184_s19 = scalar_lea.vmem %s754_s2, %s183_s9  ;;  %s654_s24 = scalar_lea.vmem [#allocation4], %s372_s5 }
  0x29   : > { %s198_s25 = scalar_lea.vmem %s754_s2, %s197_s10  ;;  %v185_v7 = vld [vmem:[%s184_s19] sm:$0x1]  ;;  %s267_s9 = sld [smem:[#allocation3 + %s266_s12]] }
  0x2a   : > { %174 = vst.msk [vmem:[%s654_s24] sm:$0x1] %vm173_vm0, %v172_v2  ;;  %v199_v8 = vld [vmem:[%s198_s25] sm:$0x1]  ;;  %v187_v9 = vadd.f32 %v186_v3, %v185_v7  ;;  %s212_s10 = scalar_lea.vmem %s754_s2, %s211_s15  ;;  %s288_s20 = sshll.u32 %s654_s24, 4  ;;  %s703_s20 = int_to_ptr.vmem [resolvable:$true] %s288_s20 }
  0x2b   : > { %v201_v10 = vadd.f32 %v200_v4, %v199_v8  ;;  %s226_s13 = scalar_lea.vmem %s754_s2, %s225_s16  ;;  %v213_v11 = vld [vmem:[%s212_s10] sm:$0x1]  ;;  %s764_s14 = sand.u32 1, %s517_s18  }
  0x2c   : > { %v227_v12 = vld [vmem:[%s226_s13] sm:$0x1]  ;;  %188 = vst.msk [vmem:[%s654_s24 + $0x1] sm:$0x1] %vm173_vm0, %v187_v9  ;;  %v215_v14 = vadd.f32 %v214_v5, %v213_v11  ;;  %s240_s19 = scalar_lea.vmem %s754_s2, %s630_s27  ;;  %s701_s13 = scalar_lea.hbm %s755_s3, %s614_s4 }
  0x2d   : > { %202 = vst.msk [vmem:[%s654_s24 + $0x2] sm:$0x1] %vm173_vm0, %v201_v10  ;;  %v229_v15 = vadd.f32 %v228_v6, %v227_v12  ;;  %v241_v17 = vld [vmem:[%s240_s19] sm:$0x1]  ;;  %s254_s30 = scalar_lea.vmem %s754_s2, %s639_s11  ;;  %s453_s6 = scalar_lea.vmem %s703_s20, 128 }
  0x2e   : > { %216 = vst.msk [vmem:[%s654_s24 + $0x3] sm:$0x1] %vm173_vm0, %v215_v14  ;;  %v243_v18 = vadd.f32 %v242_v13, %v241_v17  ;;  %v255_v19 = vld [vmem:[%s254_s30] sm:$0x1]  ;;  %p454_p2 = scmp.ne.s32.totalorder %s703_s20, %s453_s6  ;;  %s536_s15 = smov [#allocation4]  }
  0x2f   : > { %230 = vst.msk [vmem:[%s654_s24 + $0x4] sm:$0x1] %vm173_vm0, %v229_v15  ;;  %v257_v21 = vadd.f32 %v256_v16, %v255_v19  ;;  %s268_s5 = scalar_lea.vmem %s754_s2, %s267_s9  ;;  %s274_s9 = scalar_lea.sflag [#allocation5], %s764_s14 }
  0x30   : > { %244 = vst.msk [vmem:[%s654_s24 + $0x5] sm:$0x1] %vm173_vm0, %v243_v18  ;;  %v269_v22 = vld [vmem:[%s268_s5] sm:$0x1]  ;;  %p455_p3 = pnand %p454_p2, %p598_p9  ;;  %s457_s12 = sshll.u32 %s536_s15, 4  ;;  %s458_s12 = int_to_ptr.vmem [resolvable:$false] %s457_s12 }
  0x31   : > { %258 = vst.msk [vmem:[%s654_s24 + $0x6] sm:$0x1] %vm173_vm0, %v257_v21  ;;  %v271_v23 = vadd.f32 %v270_v20, %v269_v22  ;;  %s459_s19 = scalar_lea.vmem %s458_s12, 256  ;;  %p460_p5 = scmp.lt.s32.totalorder %s703_s20, %s458_s12 }
  0x32   : > { %p456_p4 = pneg %p455_p3  ;;  %p461_p6 = scmp.lt.s32.totalorder %s459_s19, %s453_s6 }
  0x33   : > { %272 = vst.msk [vmem:[%s654_s24 + $0x7] sm:$0x1] %vm173_vm0, %v271_v23 }
  0x34   : > { %p462_p7 = por %p461_p6, %p460_p5 }
  0x36   : > { %p463_p8 = pnand %p462_p7, %p456_p4 }
  0x38   : > { %466 = shalt.err (!%p463_p8)
}
  0x39   : > { %s467_s4 = scalar_lea.hbm %s701_s13, 128  ;;  %s471_s22 = scalar_lea.hbm %s755_s3, 256 }
  0x3a   : > { %p468_p10 = scmp.ne.s32.totalorder %s701_s13, %s467_s4  ;;  %p472_p0 = scmp.lt.u32.totalorder %s701_s13, %s755_s3 }
  0x3b   : > { %p473_p1 = scmp.lt.u32.totalorder %s471_s22, %s467_s4  ;;  %p475_p3 = scmp.lt.u32.totalorder %s467_s4, %s701_s13 }
  0x3c   : > { %p469_p11 = pnand %p468_p10, %p598_p9 }
  0x3d   : > { %p474_p2 = por %p473_p1, %p472_p0 }
  0x3e   : > { %p470_p12 = pneg %p469_p11 }
  0x3f   : > { %p476_p4 = por %p475_p3, %p474_p2 }
  0x41   : > { %p477_p5 = pnand %p476_p4, %p470_p12 }
  0x43   : > { %480 = shalt.err (!%p477_p5)
}
  0x44   : > { %385 = dma.vmem_to_hbm [thread:$0]  (%p598_p9), %s703_s20, 128, %s701_s13, %s274_s9  }
  0x45 PF: > { %p391_p6 = scmp.ge.s32.totalorder %s533_s21, 2  ;;  %s300_s30 = sand.u32 1, %s513_s17  }
  0x46   : > { %s301_s27 = scalar_lea.sflag [#allocation5], %s300_s30 }
  0x47   : > { %p388_p7 = pnand %p391_p6, %p605_p13 }
  0x49   : > { %508 = dma.done.wait (!%p388_p7), %s301_s27, 128  }
  0x4a   : > { %510 = vsyncadd (!%p388_p7), %s301_s27, 4294967168  ;;  %s22_s21 = sadd.s32 1, %s533_s21   ;;  %s765_s26 = sld [smem:[#allocation10_spill]] }
  0x4b   : > { %p19_p8 = scmp.ge.s32.totalorder %s22_s21, 4   ;;  %s766_s19 = sld [smem:[#allocation8_spill]] }
  0x4c   : > { %s767_s20 = sld [smem:[#allocation9_spill]]  ;;  %s768_s17 = smov %s517_s18 }
  0x4d   : > { %s769_s18 = smov %s521_s0  ;;  %21 = sbr.rel (!%p19_p8) target bundleno = 19 (0x13), region = 71 }
  0x50   : > { %s770_s0 = smov %s765_s26 }
  0x54   :  { %306 = vsyncpa [#allocation5], 1 }
  0x55   :  { %308 = vsyncpa [#allocation5 + $0x1], 1 }

</bundles_post_ra>
